<compile_context>
chip_gen: v7x
topology: tpu7x:2x2x1
jax: 0.10.0
libtpu: 0.0.40
codegen_flags: <defaults>
</compile_context>

<pallas_src>
import jax
import jax.numpy as jnp
from jax.experimental import pallas as pl
from jax.experimental.pallas import tpu as pltpu  # noqa: F401  (TPU backend)


# ----------------------------- fused kernel ----------------------------------
def _generator_kernel(z_ref, w1_ref, b1_ref, w2_ref, b2_ref,
                      gamma_ref, beta_ref, w3_ref, b3_ref, out_ref):
    bf16 = jnp.bfloat16

    # fc1 (bf16 operands, f32 MXU accumulation) + ReLU
    h1 = jnp.dot(z_ref[...].astype(bf16), w1_ref[...],
                 preferred_element_type=jnp.float32) + b1_ref[...]
    h1 = jnp.maximum(h1, 0.0)

    # fc2
    h2 = jnp.dot(h1.astype(bf16), w2_ref[...],
                 preferred_element_type=jnp.float32) + b2_ref[...]

    # BatchNorm1d, PyTorch training semantics: biased batch statistics over
    # the full batch, computed in-kernel (sublane reduce on the XLU).
    mean = jnp.mean(h2, axis=0, keepdims=True)
    var = jnp.mean(jnp.square(h2 - mean), axis=0, keepdims=True)
    scale = gamma_ref[...] * jax.lax.rsqrt(var + 1e-5)
    shift = beta_ref[...] - mean * scale
    # TODO(synk): running_mean / running_var momentum update (training-time
    # buffer side effect) is not materialized; it does not affect the output.

    # Fused BN apply + ReLU (2 VPU ops per element)
    h = jnp.maximum(h2 * scale + shift, 0.0)

    # fc3 + tanh
    h3 = jnp.dot(h.astype(bf16), w3_ref[...],
                 preferred_element_type=jnp.float32) + b3_ref[...]
    out_ref[...] = jnp.tanh(h3)


# ------------------------------ host wrappers ---------------------------------
def prepare_params(params):
    """One-time weight preprocessing: cast matmul weights to bf16.

    Call once; do NOT call per forward (keeps the hot path free of wrapper
    pad/cast ops).
    """
    w1, b1, w2, b2, gamma, beta, w3, b3 = params
    bf16 = jnp.bfloat16
    return (w1.astype(bf16), b1, w2.astype(bf16), b2,
            gamma, beta, w3.astype(bf16), b3)


@jax.jit
def generator_forward(z, prepared_params):
    """z: [B, latent_dim] float32 -> [B, img_shape] float32."""
    w1, b1, w2, b2, gamma, beta, w3, b3 = prepared_params
    B, latent = z.shape
    H1, H2 = w1.shape[1], w2.shape[1]          # 128, 256
    img = w3.shape[1]

    cost = pl.CostEstimate(
        flops=2 * B * (latent * H1 + H1 * H2 + H2 * img),
        transcendentals=B * img + H2,
        bytes_accessed=(z.size * 4 + (w1.size + w2.size + w3.size) * 2
                        + (b1.size + b2.size + b3.size
                           + gamma.size + beta.size) * 4
                        + B * img * 4),
    )

    # Whole batch in a single VMEM-resident tile (no grid): all activations,
    # the batch-statistics reduction and the final tanh stay on-chip; the only
    # HBM traffic is the inputs and the final output.
    out = pl.pallas_call(
        _generator_kernel,
        out_shape=jax.ShapeDtypeStruct((B, img), jnp.float32),
        cost_estimate=cost,
    )(z, w1, b1, w2, b2, gamma, beta, w3, b3)
    return out


def init_params(key, latent_dim, img_shape):
    """Deterministic synthetic parameters (shapes match the PyTorch module).

    Linear weights are stored pre-transposed as [in, out]; biases as [1, out].
    """
    ks = jax.random.split(key, 6)
    scale = 0.05
    w1 = scale * jax.random.normal(ks[0], (latent_dim, 128), jnp.float32)
    b1 = scale * jax.random.normal(ks[1], (1, 128), jnp.float32)
    w2 = scale * jax.random.normal(ks[2], (128, 256), jnp.float32)
    b2 = scale * jax.random.normal(ks[3], (1, 256), jnp.float32)
    gamma = jnp.ones((1, 256), jnp.float32)   # BatchNorm1d defaults
    beta = jnp.zeros((1, 256), jnp.float32)
    w3 = scale * jax.random.normal(ks[4], (256, img_shape), jnp.float32)
    b3 = scale * jax.random.normal(ks[5], (1, img_shape), jnp.float32)
    return (w1, b1, w2, b2, gamma, beta, w3, b3)


def generator_ref(z, params):
    """Pure-JAX reference with the same bf16-operand / f32-accumulate matmuls."""
    w1, b1, w2, b2, gamma, beta, w3, b3 = params
    bf = jnp.bfloat16
    h1 = jnp.maximum(
        jnp.dot(z.astype(bf), w1.astype(bf),
                preferred_element_type=jnp.float32) + b1, 0.0)
    h2 = jnp.dot(h1.astype(bf), w2.astype(bf),
                 preferred_element_type=jnp.float32) + b2
    mean = jnp.mean(h2, axis=0, keepdims=True)
    var = jnp.mean(jnp.square(h2 - mean), axis=0, keepdims=True)
    sc = gamma * jax.lax.rsqrt(var + 1e-5)
    sh = beta - mean * sc
    h2n = jnp.maximum(h2 * sc + sh, 0.0)
    h3 = jnp.dot(h2n.astype(bf), w3.astype(bf),
                 preferred_element_type=jnp.float32) + b3
    return jnp.tanh(h3)


if __name__ == "__main__":
    latent_dim = 64
    img_shape = 784     # flattened 28x28 image
    batch = 32          # small batch; whole forward fits one VMEM tile

    key = jax.random.PRNGKey(0)
    k_z, k_p = jax.random.split(key)
    z = jax.random.normal(k_z, (batch, latent_dim), jnp.float32)
    params = init_params(k_p, latent_dim, img_shape)
    prepared = prepare_params(params)          # one-time weight cast (bf16)

    out = jax.block_until_ready(generator_forward(z, prepared))
    ref = generator_ref(z, params)

    assert out.shape == (batch, img_shape)
    assert jnp.allclose(out, ref, atol=5e-3, rtol=5e-3), (
        f"mismatch vs reference, max abs err = {jnp.max(jnp.abs(out - ref))}")

    print("KERNEL_OK")
</pallas_src>

<mosaic_0001>
module attributes {stable_mosaic.version = 11 : i64} {
  func.func @_generator_kernel(%arg0: memref<32x64xf32, #tpu.memory_space<vmem>>, %arg1: memref<64x128xbf16, #tpu.memory_space<vmem>>, %arg2: memref<1x128xf32, #tpu.memory_space<vmem>>, %arg3: memref<128x256xbf16, #tpu.memory_space<vmem>>, %arg4: memref<1x256xf32, #tpu.memory_space<vmem>>, %arg5: memref<1x256xf32, #tpu.memory_space<vmem>>, %arg6: memref<1x256xf32, #tpu.memory_space<vmem>>, %arg7: memref<256x784xbf16, #tpu.memory_space<vmem>>, %arg8: memref<1x784xf32, #tpu.memory_space<vmem>>, %arg9: memref<32x784xf32, #tpu.memory_space<vmem>>) attributes {dimension_semantics = [], scalar_prefetch = 0 : i64, scratch_operands = 0 : i64, tpu.core_type = #tpu.core_type<tc>} {
    %c0 = arith.constant 0 : index
    %c0_0 = arith.constant 0 : index
    %0 = vector.load %arg0[%c0, %c0_0] : memref<32x64xf32, #tpu.memory_space<vmem>>, vector<32x64xf32>
    %1 = arith.truncf %0 : vector<32x64xf32> to vector<32x64xbf16>
    %c0_1 = arith.constant 0 : index
    %c0_2 = arith.constant 0 : index
    %2 = vector.load %arg1[%c0_1, %c0_2] : memref<64x128xbf16, #tpu.memory_space<vmem>>, vector<64x128xbf16>
    %cst = arith.constant dense<0.000000e+00> : vector<32x128xf32>
    %3 = tpu.matmul %1, %2, %cst {dimension_numbers = #tpu.dot_dimension_numbers<[1], [0], [0], [1], [0, 0, 1, 1], [], []>} : vector<32x64xbf16>, vector<64x128xbf16>, vector<32x128xf32> -> vector<32x128xf32>
    %c0_3 = arith.constant 0 : index
    %c0_4 = arith.constant 0 : index
    %4 = vector.load %arg2[%c0_3, %c0_4] : memref<1x128xf32, #tpu.memory_space<vmem>>, vector<1x128xf32>
    %5 = vector.broadcast %4 : vector<1x128xf32> to vector<32x128xf32>
    %6 = arith.addf %3, %5 : vector<32x128xf32>
    %cst_5 = arith.constant 0.000000e+00 : f32
    %7 = vector.broadcast %cst_5 : f32 to vector<32x128xf32>
    %8 = arith.maximumf %6, %7 : vector<32x128xf32>
    %9 = arith.truncf %8 : vector<32x128xf32> to vector<32x128xbf16>
    %c0_6 = arith.constant 0 : index
    %c0_7 = arith.constant 0 : index
    %10 = vector.load %arg3[%c0_6, %c0_7] : memref<128x256xbf16, #tpu.memory_space<vmem>>, vector<128x256xbf16>
    %cst_8 = arith.constant dense<0.000000e+00> : vector<32x256xf32>
    %11 = tpu.matmul %9, %10, %cst_8 {dimension_numbers = #tpu.dot_dimension_numbers<[1], [0], [0], [1], [0, 0, 1, 1], [], []>} : vector<32x128xbf16>, vector<128x256xbf16>, vector<32x256xf32> -> vector<32x256xf32>
    %c0_9 = arith.constant 0 : index
    %c0_10 = arith.constant 0 : index
    %12 = vector.load %arg4[%c0_9, %c0_10] : memref<1x256xf32, #tpu.memory_space<vmem>>, vector<1x256xf32>
    %13 = vector.broadcast %12 : vector<1x256xf32> to vector<32x256xf32>
    %14 = arith.addf %11, %13 : vector<32x256xf32>
    %cst_11 = arith.constant dense<0.000000e+00> : vector<256xf32>
    %15 = vector.multi_reduction <add>, %14, %cst_11 [0] : vector<32x256xf32> to vector<256xf32>
    %16 = vector.shape_cast %15 : vector<256xf32> to vector<1x256xf32>
    %cst_12 = arith.constant 3.200000e+01 : f32
    %17 = vector.broadcast %cst_12 : f32 to vector<1x256xf32>
    %18 = arith.divf %16, %17 : vector<1x256xf32>
    %19 = vector.broadcast %18 : vector<1x256xf32> to vector<32x256xf32>
    %20 = arith.subf %14, %19 : vector<32x256xf32>
    %21 = arith.mulf %20, %20 : vector<32x256xf32>
    %cst_13 = arith.constant dense<0.000000e+00> : vector<256xf32>
    %22 = vector.multi_reduction <add>, %21, %cst_13 [0] : vector<32x256xf32> to vector<256xf32>
    %23 = vector.shape_cast %22 : vector<256xf32> to vector<1x256xf32>
    %cst_14 = arith.constant 3.200000e+01 : f32
    %24 = vector.broadcast %cst_14 : f32 to vector<1x256xf32>
    %25 = arith.divf %23, %24 : vector<1x256xf32>
    %c0_15 = arith.constant 0 : index
    %c0_16 = arith.constant 0 : index
    %26 = vector.load %arg5[%c0_15, %c0_16] : memref<1x256xf32, #tpu.memory_space<vmem>>, vector<1x256xf32>
    %cst_17 = arith.constant 9.99999974E-6 : f32
    %27 = vector.broadcast %cst_17 : f32 to vector<1x256xf32>
    %28 = arith.addf %25, %27 : vector<1x256xf32>
    %29 = math.rsqrt %28 : vector<1x256xf32>
    %30 = arith.mulf %26, %29 : vector<1x256xf32>
    %c0_18 = arith.constant 0 : index
    %c0_19 = arith.constant 0 : index
    %31 = vector.load %arg6[%c0_18, %c0_19] : memref<1x256xf32, #tpu.memory_space<vmem>>, vector<1x256xf32>
    %32 = arith.mulf %18, %30 : vector<1x256xf32>
    %33 = arith.subf %31, %32 : vector<1x256xf32>
    %34 = vector.broadcast %30 : vector<1x256xf32> to vector<32x256xf32>
    %35 = arith.mulf %14, %34 : vector<32x256xf32>
    %36 = vector.broadcast %33 : vector<1x256xf32> to vector<32x256xf32>
    %37 = arith.addf %35, %36 : vector<32x256xf32>
    %cst_20 = arith.constant 0.000000e+00 : f32
    %38 = vector.broadcast %cst_20 : f32 to vector<32x256xf32>
    %39 = arith.maximumf %37, %38 : vector<32x256xf32>
    %40 = arith.truncf %39 : vector<32x256xf32> to vector<32x256xbf16>
    %c0_21 = arith.constant 0 : index
    %c0_22 = arith.constant 0 : index
    %41 = vector.load %arg7[%c0_21, %c0_22] : memref<256x784xbf16, #tpu.memory_space<vmem>>, vector<256x784xbf16>
    %cst_23 = arith.constant dense<0.000000e+00> : vector<32x784xf32>
    %42 = tpu.matmul %40, %41, %cst_23 {dimension_numbers = #tpu.dot_dimension_numbers<[1], [0], [0], [1], [0, 0, 1, 1], [], []>} : vector<32x256xbf16>, vector<256x784xbf16>, vector<32x784xf32> -> vector<32x784xf32>
    %c0_24 = arith.constant 0 : index
    %c0_25 = arith.constant 0 : index
    %43 = vector.load %arg8[%c0_24, %c0_25] : memref<1x784xf32, #tpu.memory_space<vmem>>, vector<1x784xf32>
    %44 = vector.broadcast %43 : vector<1x784xf32> to vector<32x784xf32>
    %45 = arith.addf %42, %44 : vector<32x784xf32>
    %46 = math.tanh %45 : vector<32x784xf32>
    %c0_26 = arith.constant 0 : index
    %c0_27 = arith.constant 0 : index
    %47 = vector.load %arg9[%c0_26, %c0_27] : memref<32x784xf32, #tpu.memory_space<vmem>>, vector<32x784xf32>
    tpu.vector_store %arg9[%c0_26, %c0_27], %46 {strides = array<i32>} : memref<32x784xf32, #tpu.memory_space<vmem>>, vector<32x784xf32>,
    return
  }
}

</mosaic_0001>

<bundles_post_ra>
// kernel: generator_forward.1
= control target key start
LH: loop header
LB: loop body
LE: loop exit
PB: predicated region body
PF: predicated region fallthrough
CT: control target
= control target key end

     0   :  { %vm79_vm0 = vcmask 523264   ;;  %s2516_s0 = inlined_call_operand.vmem [shape: f32[32,64], index: 0, kind: input, shape index: {}]   ;;  %s2517_s1 = inlined_call_operand.vmem [shape: bf16[64,128], index: 1, kind: input, shape index: {}]   ;;  %s2518_s2 = inlined_call_operand.vmem [shape: f32[1,128], index: 2, kind: input, shape index: {}]   ;;  %s2519_s3 = inlined_call_operand.vmem [shape: bf16[128,256], index: 3, kind: input, shape index: {}]   ;;  %s2520_s4 = inlined_call_operand.vmem [shape: f32[1,256], index: 4, kind: input, shape index: {}]   ;;  %s2521_s5 = inlined_call_operand.vmem [shape: f32[1,256], index: 5, kind: input, shape index: {}]   ;;  %s2522_s6 = inlined_call_operand.vmem [shape: f32[1,256], index: 6, kind: input, shape index: {}]   ;;  %s2523_s7 = inlined_call_operand.vmem [shape: bf16[256,784], index: 7, kind: input, shape index: {}]   ;;  %s2524_s8 = inlined_call_operand.vmem [shape: f32[1,784], index: 8, kind: input, shape index: {}]   ;;  %s2525_s9 = inlined_call_operand.hbm [shape: f32[32,784], index: 9, kind: output, shape index: {}]  }
   0x1   :  { %v1663_v0 = vld [vmem:[%s2517_s1] sm:$0xff]   ;;  %v1664_v1 = vld [vmem:[%s2517_s1 + $0x8] sm:$0xff]   ;;  %v1665_v2 = vld [vmem:[%s2517_s1 + $0x10] sm:$0xff]  }
   0x2   :  { %1646 = vmatprep.subr.bf16.mxu0 %v1663_v0  ;;  %v34_v3 = vld [vmem:[%s2516_s0] sm:$0xff]  ;;  %v35_v4 = vld [vmem:[%s2516_s0 + $0x8] sm:$0xff]  ;;  %v1670_v8 = vld [vmem:[%s2519_s3 + $0x14] ss:$8 sps:$4 sm:$0xff]  }
   0x3   :  { %1647 = vmatpush3.bf16.msra.mxu0 %v1663_v0  ;;  %v38_v5 = vpack.c.bf16 %v35_v4, %v34_v3  ;;  %v1667_v6 = vld [vmem:[%s2519_s3 + $0x4] ss:$8 sps:$4 sm:$0xff]   ;;  %v1669_v7 = vld [vmem:[%s2519_s3] ss:$8 sps:$4 sm:$0xff]   ;;  %v1666_v9 = vld [vmem:[%s2517_s1 + $0x18] sm:$0xff]  }
   0x4   :  { %1648 = vmatprep.subr.bf16.mxu0 %v1664_v1  ;;  %249 = vmatprep.subr.bf16.mxu1 %v1667_v6  ;;  %v1672_v10 = vld [vmem:[%s2519_s3 + $0x10] ss:$8 sps:$4 sm:$0xff]   ;;  %v1673_v11 = vld [vmem:[%s2519_s3 + $0x24] ss:$8 sps:$4 sm:$0xff]   ;;  %v1675_v14 = vld [vmem:[%s2519_s3 + $0x20] ss:$8 sps:$4 sm:$0xff]  }
   0x5   :  { %1654 = vmatprep.mubr.msk.bf16.mxu0 %vm79_vm0, %v38_v5  ;;  %250 = vmatpush1.bf16.msra.mxu1 %v1669_v7  ;;  %v36_v12 = vld [vmem:[%s2516_s0 + $0x10] sm:$0xff]  ;;  %v37_v13 = vld [vmem:[%s2516_s0 + $0x18] sm:$0xff]  ;;  %v1679_v18 = vld [vmem:[%s2519_s3 + $0x44] ss:$8 sps:$4 sm:$0xff]  }
   0x6   :  { %251 = vmatprep.subr.bf16.mxu1 %v1670_v8  ;;  %v1676_v15 = vld [vmem:[%s2519_s3 + $0x34] ss:$8 sps:$4 sm:$0xff]   ;;  %v39_v16 = vpack.c.bf16 %v37_v13, %v36_v12  ;;  %v1678_v17 = vld [vmem:[%s2519_s3 + $0x30] ss:$8 sps:$4 sm:$0xff]   ;;  %v1681_v19 = vld [vmem:[%s2519_s3 + $0x40] ss:$8 sps:$4 sm:$0xff]  }
   0x7   :  { %1649 = vmatpush3.bf16.msra.mxu0 %v1664_v1  ;;  %v1682_v20 = vld [vmem:[%s2519_s3 + $0x54] ss:$8 sps:$4 sm:$0xff]   ;;  %v1684_v21 = vld [vmem:[%s2519_s3 + $0x50] ss:$8 sps:$4 sm:$0xff]  }
   0x8   :  { %1650 = vmatprep.subr.bf16.mxu0 %v1665_v2 }
   0x9   :  { %252 = vmatpush1.bf16.msra.mxu1 %v1672_v10 }
   0xa   :  { %253 = vmatprep.subr.bf16.mxu1 %v1673_v11 }
   0xb   :  { %1651 = vmatpush3.bf16.msra.mxu0 %v1665_v2 }
   0xc   :  { %1652 = vmatprep.subr.bf16.mxu0 %v1666_v9 }
   0xd   :  { %254 = vmatpush1.bf16.msra.mxu1 %v1675_v14 }
   0xe   :  { %255 = vmatprep.subr.bf16.mxu1 %v1676_v15 }
   0xf   :  { %1653 = vmatpush3.bf16.msra.mxu0 %v1666_v9 }
  0x11   :  { %256 = vmatpush1.bf16.msra.mxu1 %v1678_v17 }
  0x12   :  { %1655 = vmatmul.mubr.msk.bf16.vlgmr.msra.gmra.mrb[0].mxu0 %vm79_vm0, %v39_v16  ;;  %257 = vmatprep.subr.bf16.mxu1 %v1679_v18 }
  0x15   :  { %258 = vmatpush1.bf16.msra.mxu1 %v1681_v19 }
  0x16   :  { %259 = vmatprep.subr.bf16.mxu1 %v1682_v20 }
  0x19   :  { %260 = vmatpush1.bf16.msra.mxu1 %v1684_v21 }
  0x1a   :  { %14 = vsyncpa [#allocation3], 0  ;;  %v1685_v22 = vld [vmem:[%s2519_s3 + $0x64] ss:$8 sps:$4 sm:$0xff]   ;;  %v1687_v23 = vld [vmem:[%s2519_s3 + $0x60] ss:$8 sps:$4 sm:$0xff]  }
  0x1b   :  { %261 = vmatprep.subr.bf16.mxu1 %v1685_v22  ;;  %v1688_v24 = vld [vmem:[%s2519_s3 + $0x74] ss:$8 sps:$4 sm:$0xff]   ;;  %v1690_v25 = vld [vmem:[%s2519_s3 + $0x70] ss:$8 sps:$4 sm:$0xff]   ;;  %v1935_v26 = vmov 0   ;;  %vm1438_vm1 = vcmask 130048  }
  0x1c   :  { %281 = vmatprep.mubr.bf16.mxu1 %v1935_v26  ;;  %v1477_v27 = vld [vmem:[%s2518_s2] ss:$0 sm:$0xff]  ;;  %v1696_v43 = vld [vmem:[%s2523_s7 + $0xc] ss:$28 sps:$4 sm:$0xff]   ;;  %v1699_v46 = vld [vmem:[%s2523_s7 + $0x3c] ss:$28 sps:$4 sm:$0xff]  }
  0x1d   :  { %262 = vmatpush1.bf16.msra.mxu1 %v1687_v23  ;;  %v1693_v42 = vld [vmem:[%s2523_s7 + $0x4] ss:$28 sps:$4 sm:$0xff]   ;;  %v1697_v48 = vld [vmem:[%s2523_s7 + $0x38] ss:$28 sps:$4 sm:$0xff]   ;;  %v1703_v52 = vld [vmem:[%s2523_s7 + $0x70] ss:$28 sps:$4 sm:$0xff]  }
  0x1e   :  { %263 = vmatprep.subr.bf16.mxu1 %v1688_v24  ;;  %v1691_v44 = vld [vmem:[%s2523_s7] ss:$28 sps:$4 sm:$0xff]   ;;  %v1694_v45 = vld [vmem:[%s2523_s7 + $0x8] ss:$28 sps:$4 sm:$0xff]   ;;  %1196 = vmatprep.subr.bf16.mxu0 %v1693_v42  ;;  %v1705_v50 = vld [vmem:[%s2523_s7 + $0x74] ss:$28 sps:$4 sm:$0xff]  }
  0x1f   :  { %1197 = vmatpush1.bf16.msra.mxu0 %v1691_v44  ;;  %v1702_v47 = vld [vmem:[%s2523_s7 + $0x44] ss:$28 sps:$4 sm:$0xff]   ;;  %v1708_v51 = vld [vmem:[%s2523_s7 + $0x7c] ss:$28 sps:$4 sm:$0xff]   ;;  %v1711_v54 = vld [vmem:[%s2523_s7 + $0xac] ss:$28 sps:$4 sm:$0xff]   ;;  %v159_v44 = vlaneseq }
  0x20   :  { %v1700_v49 = vld [vmem:[%s2523_s7 + $0x40] ss:$28 sps:$4 sm:$0xff]   ;;  %1198 = vmatprep.subr.bf16.mxu0 %v1699_v46  ;;  %v1706_v53 = vld [vmem:[%s2523_s7 + $0x78] ss:$28 sps:$4 sm:$0xff]   ;;  %v1709_v56 = vld [vmem:[%s2523_s7 + $0xa8] ss:$28 sps:$4 sm:$0xff]  }
  0x21   :  { %264 = vmatpush1.bf16.msra.mxu1 %v1690_v25  ;;  %v1714_v55 = vld [vmem:[%s2523_s7 + $0xb4] ss:$28 sps:$4 sm:$0xff]   ;;  %v1717_v58 = vld [vmem:[%s2523_s7 + $0xe4] ss:$28 sps:$4 sm:$0xff]   ;;  %v1720_v59 = vld [vmem:[%s2523_s7 + $0xec] ss:$28 sps:$4 sm:$0xff]  }
  0x22   :  { %1249 = vmatprep.subr.bf16.mxu1 %v1696_v43  ;;  %v1712_v57 = vld [vmem:[%s2523_s7 + $0xb0] ss:$28 sps:$4 sm:$0xff]   ;;  %v1715_v60 = vld [vmem:[%s2523_s7 + $0xe0] ss:$28 sps:$4 sm:$0xff]   ;;  %v1718_v61 = vld [vmem:[%s2523_s7 + $0xe8] ss:$28 sps:$4 sm:$0xff]  }
  0x23   :  { %1199 = vmatpush1.bf16.msra.mxu0 %v1697_v48  ;;  %v1723_v62 = vld [vmem:[%s2523_s7 + $0x11c] ss:$28 sps:$4 sm:$0xff]   ;;  %v1726_v63 = vld [vmem:[%s2523_s7 + $0x124] ss:$28 sps:$4 sm:$0xff]   ;;  %v1729_v2 = vld [vmem:[%s2523_s7 + $0x154] ss:$28 sps:$4 sm:$0xff]  }
  0x24   :  { %1200 = vmatprep.subr.bf16.mxu0 %v1705_v50  ;;  %v1721_v0 = vld [vmem:[%s2523_s7 + $0x118] ss:$28 sps:$4 sm:$0xff]   ;;  %v1724_v1 = vld [vmem:[%s2523_s7 + $0x120] ss:$28 sps:$4 sm:$0xff]   ;;  %v1727_v4 = vld [vmem:[%s2523_s7 + $0x150] ss:$28 sps:$4 sm:$0xff]  }
  0x25   :  { %v1732_v3 = vld [vmem:[%s2523_s7 + $0x15c] ss:$28 sps:$4 sm:$0xff]   ;;  %v1735_v6 = vld [vmem:[%s2523_s7 + $0x18c] ss:$28 sps:$4 sm:$0xff]   ;;  %v1738_v7 = vld [vmem:[%s2523_s7 + $0x194] ss:$28 sps:$4 sm:$0xff]  }
  0x26   :  { %v1730_v5 = vld [vmem:[%s2523_s7 + $0x158] ss:$28 sps:$4 sm:$0xff]   ;;  %v1733_v8 = vld [vmem:[%s2523_s7 + $0x188] ss:$28 sps:$4 sm:$0xff]   ;;  %v1736_v9 = vld [vmem:[%s2523_s7 + $0x190] ss:$28 sps:$4 sm:$0xff]  }
  0x27   :  { %1201 = vmatpush1.bf16.msra.mxu0 %v1703_v52  ;;  %v1741_v10 = vld [vmem:[%s2523_s7 + $0x1c4] ss:$28 sps:$4 sm:$0xff]   ;;  %v1744_v11 = vld [vmem:[%s2523_s7 + $0x1cc] ss:$28 sps:$4 sm:$0xff]   ;;  %v1747_v14 = vld [vmem:[%s2523_s7 + $0x1fc] ss:$28 sps:$4 sm:$0xff]  }
  0x28   :  { %1202 = vmatprep.subr.bf16.mxu0 %v1711_v54  ;;  %v1739_v12 = vld [vmem:[%s2523_s7 + $0x1c0] ss:$28 sps:$4 sm:$0xff]   ;;  %v1742_v13 = vld [vmem:[%s2523_s7 + $0x1c8] ss:$28 sps:$4 sm:$0xff]   ;;  %v1745_v16 = vld [vmem:[%s2523_s7 + $0x1f8] ss:$28 sps:$4 sm:$0xff]  }
  0x29   :  { %v1750_v15 = vld [vmem:[%s2523_s7 + $0x204] ss:$28 sps:$4 sm:$0xff]   ;;  %v1753_v18 = vld [vmem:[%s2523_s7 + $0x234] ss:$28 sps:$4 sm:$0xff]   ;;  %v1756_v19 = vld [vmem:[%s2523_s7 + $0x23c] ss:$28 sps:$4 sm:$0xff]  }
  0x2a   :  { %v1748_v17 = vld [vmem:[%s2523_s7 + $0x200] ss:$28 sps:$4 sm:$0xff]   ;;  %v1751_v20 = vld [vmem:[%s2523_s7 + $0x230] ss:$28 sps:$4 sm:$0xff]   ;;  %v1754_v21 = vld [vmem:[%s2523_s7 + $0x238] ss:$28 sps:$4 sm:$0xff]  }
  0x2b   :  { %1203 = vmatpush1.bf16.msra.mxu0 %v1709_v56  ;;  %v1759_v22 = vld [vmem:[%s2523_s7 + $0x26c] ss:$28 sps:$4 sm:$0xff]   ;;  %v1762_v23 = vld [vmem:[%s2523_s7 + $0x274] ss:$28 sps:$4 sm:$0xff]  }
  0x2c   :  { %1204 = vmatprep.subr.bf16.mxu0 %v1717_v58  ;;  %v1757_v24 = vld [vmem:[%s2523_s7 + $0x268] ss:$28 sps:$4 sm:$0xff]   ;;  %v1760_v25 = vld [vmem:[%s2523_s7 + $0x270] ss:$28 sps:$4 sm:$0xff]   ;;  %v1790_v43 = vld [vmem:[%s2523_s7 + $0x1d8] ss:$28 sps:$4 sm:$0xff]  }
  0x2d   :  { %v1789_v42 = vld [vmem:[%s2523_s7 + $0x14] ss:$28 sps:$4 sm:$0xff]  }
  0x2f   :  { %1205 = vmatpush1.bf16.msra.mxu0 %v1715_v60 }
  0x30   :  { %1206 = vmatprep.subr.bf16.mxu0 %v1723_v62 }
  0x33   :  { %1207 = vmatpush1.bf16.msra.mxu0 %v1721_v0 }
  0x34   :  { %1208 = vmatprep.subr.bf16.mxu0 %v1729_v2 }
  0x37   :  { %1209 = vmatpush1.bf16.msra.mxu0 %v1727_v4 }
  0x38   :  { %1210 = vmatprep.subr.bf16.mxu0 %v1735_v6 }
  0x3b   :  { %1211 = vmatpush1.bf16.msra.mxu0 %v1733_v8 }
  0x3c   :  { %1212 = vmatprep.subr.bf16.mxu0 %v1741_v10 }
  0x3f   :  { %1213 = vmatpush1.bf16.msra.mxu0 %v1739_v12 }
  0x40   :  { %1214 = vmatprep.subr.bf16.mxu0 %v1747_v14 }
  0x43   :  { %1215 = vmatpush1.bf16.msra.mxu0 %v1745_v16 }
  0x44   :  { %1216 = vmatprep.subr.bf16.mxu0 %v1753_v18 }
  0x47   :  { %1217 = vmatpush1.bf16.msra.mxu0 %v1751_v20 }
  0x48   :  { %1218 = vmatprep.subr.bf16.mxu0 %v1759_v22 }
  0x4b   :  { %1219 = vmatpush1.bf16.msra.mxu0 %v1757_v24 }
  0xe5   :  { %v1656_v28 = vpop.f32.mrb[0].mxu0 }
  0xe6   :  { %v129_v29 = vadd.f32 %v1656_v28, %v1477_v27  ;;  %v120_v30 = vpop.f32.mrb[1].mxu0  ;;  %v1763_v28 = vld [vmem:[%s2523_s7 + $0x2a0] ss:$28 sps:$4 sm:$0xff]  }
  0xe7   :  { %v121_v31 = vadd.f32 %v1477_v27, %v120_v30  ;;  %v1657_v32 = vpop.f32.mrb[2].mxu0  ;;  %v1771_v30 = vld [vmem:[%s2523_s7 + $0x2dc] ss:$28 sps:$4 sm:$0xff]  }
  0xe8   :  { %v132_v33 = vadd.f32 %v1657_v32, %v1477_v27  ;;  %v123_v34 = vpop.f32.mrb[3].mxu0  ;;  %v137_v36 = vmax.f32 %v129_v29, 0.0  ;;  %v1766_v29 = vld [vmem:[%s2523_s7 + $0x2a8] ss:$28 sps:$4 sm:$0xff]   ;;  %v1769_v32 = vld [vmem:[%s2523_s7 + $0x2d8] ss:$28 sps:$4 sm:$0xff]  }
  0xe9   :  { %v124_v35 = vadd.f32 %v1477_v27, %v123_v34  ;;  %v135_v38 = vmax.f32 %v121_v31, 0.0  ;;  %v1768_v27 = vld [vmem:[%s2523_s7 + $0x2ac] ss:$28 sps:$4 sm:$0xff]   ;;  %v1774_v31 = vld [vmem:[%s2523_s7 + $0x2e4] ss:$28 sps:$4 sm:$0xff]  }
  0xea   :  { %v138_v37 = vmax.f32 %v132_v33, 0.0  ;;  %v1772_v33 = vld [vmem:[%s2523_s7 + $0x2e0] ss:$28 sps:$4 sm:$0xff]   ;;  %v1777_v34 = vld [vmem:[%s2523_s7 + $0x314] ss:$28 sps:$4 sm:$0xff]  }
  0xeb   :  { %v136_v39 = vmax.f32 %v124_v35, 0.0  ;;  %v1780_v35 = vld [vmem:[%s2523_s7 + $0x31c] ss:$28 sps:$4 sm:$0xff]  }
  0xec   :  { %v140_v40 = vpack.c.bf16 %v138_v37, %v137_v36  ;;  %v1775_v36 = vld [vmem:[%s2523_s7 + $0x310] ss:$28 sps:$4 sm:$0xff]   ;;  %v1778_v37 = vld [vmem:[%s2523_s7 + $0x318] ss:$28 sps:$4 sm:$0xff]  }
  0xed   :  { %v139_v41 = vpack.c.bf16 %v136_v39, %v135_v38  ;;  %v1783_v38 = vld [vmem:[%s2523_s7 + $0x34c] ss:$28 sps:$4 sm:$0xff]   ;;  %v1786_v39 = vld [vmem:[%s2523_s7 + $0x354] ss:$28 sps:$4 sm:$0xff]  }
  0xef   :  { %282 = vmatmul.mubr.bf16.vlgmr.msra.gmra.mrb[0].mxu1 %v139_v41  ;;  %v1784_v41 = vld [vmem:[%s2523_s7 + $0x350] ss:$28 sps:$4 sm:$0xff]  }
  0xf0   :  { %291 = vmatprep.mubr.bf16.mxu1 %v1935_v26  ;;  %1250 = vmatpush1.bf16.msra.mxu1 %v1694_v45  ;;  %v1765_v26 = vld [vmem:[%s2523_s7 + $0x2a4] ss:$28 sps:$4 sm:$0xff]   ;;  %v2265_v45 = vshrl.u32 %v159_v44, 7 }
  0xf1   :  { %1251 = vmatprep.subr.bf16.mxu1 %v1702_v47  ;;  %1220 = vmatprep.subr.bf16.mxu0 %v1765_v26  ;;  %v157_v47 = vld [vmem:[%s2520_s4] sm:$0x3] }
  0xf2   :  { %1221 = vmatpush1.bf16.msra.mxu0 %v1763_v28  ;;  %v2268_v46 = vsub.s32 0, %v2265_v45 }
  0xf3   :  { %1222 = vmatprep.subr.bf16.mxu0 %v1771_v30 }
  0xf4   :  { %1252 = vmatpush1.bf16.msra.mxu1 %v1700_v49  ;;  %v2274_v49 = vsub.s32 1, %v2265_v45  ;;  %v162_v52 = vrot.slane %v157_v47, %v2268_v46 }
  0xf5   :  { %1253 = vmatprep.subr.bf16.mxu1 %v1708_v51 }
  0xf6   :  { %1223 = vmatpush1.bf16.msra.mxu0 %v1769_v32  ;;  %v166_v54 = vrot.slane %v157_v47, %v2274_v49 }
  0xf7   :  { %292 = vmatmul.mubr.bf16.gmra.mrb[4].mxu1 %v140_v40  ;;  %1224 = vmatprep.subr.bf16.mxu0 %v1777_v34  ;;  %v1781_v40 = vld [vmem:[%s2523_s7 + $0x348] ss:$28 sps:$4 sm:$0xff]  }
  0xf8   :  { %1254 = vmatpush1.bf16.msra.mxu1 %v1706_v53 }
  0xf9   :  { %1255 = vmatprep.subr.bf16.mxu1 %v1714_v55 }
  0xfa   :  { %1225 = vmatpush1.bf16.msra.mxu0 %v1775_v36 }
  0xfb   :  { %1226 = vmatprep.subr.bf16.mxu0 %v1783_v38 }
  0xfc   :  { %1256 = vmatpush1.bf16.msra.mxu1 %v1712_v57 }
  0xfd   :  { %1257 = vmatprep.subr.bf16.mxu1 %v1720_v59 }
  0xfe   :  { %1227 = vmatpush1.bf16.msra.mxu0 %v1781_v40 }
  0xff   :  { %1302 = vmatprep.subr.bf16.mxu0 %v1789_v42 }
 0x100   :  { %1258 = vmatpush1.bf16.msra.mxu1 %v1718_v61 }
 0x101   :  { %1259 = vmatprep.subr.bf16.mxu1 %v1726_v63 }
 0x104   :  { %1260 = vmatpush1.bf16.msra.mxu1 %v1724_v1 }
 0x105   :  { %1261 = vmatprep.subr.bf16.mxu1 %v1732_v3 }
 0x108   :  { %1262 = vmatpush1.bf16.msra.mxu1 %v1730_v5 }
 0x109   :  { %1263 = vmatprep.subr.bf16.mxu1 %v1738_v7 }
 0x10c   :  { %1264 = vmatpush1.bf16.msra.mxu1 %v1736_v9 }
 0x10d   :  { %1265 = vmatprep.subr.bf16.mxu1 %v1744_v11 }
 0x110   :  { %1266 = vmatpush1.bf16.msra.mxu1 %v1742_v13 }
 0x111   :  { %1267 = vmatprep.subr.bf16.mxu1 %v1750_v15 }
 0x114   :  { %1268 = vmatpush1.bf16.msra.mxu1 %v1748_v17 }
 0x115   :  { %1269 = vmatprep.subr.bf16.mxu1 %v1756_v19 }
 0x118   :  { %1270 = vmatpush1.bf16.msra.mxu1 %v1754_v21 }
 0x119   :  { %1271 = vmatprep.subr.bf16.mxu1 %v1762_v23 }
 0x11c   :  { %1272 = vmatpush1.bf16.msra.mxu1 %v1760_v25 }
 0x11d   :  { %1273 = vmatprep.subr.bf16.mxu1 %v1768_v27 }
 0x120   :  { %1274 = vmatpush1.bf16.msra.mxu1 %v1766_v29 }
 0x121   :  { %1275 = vmatprep.subr.bf16.mxu1 %v1774_v31 }
 0x124   :  { %1276 = vmatpush1.bf16.msra.mxu1 %v1772_v33 }
 0x125   :  { %1277 = vmatprep.subr.bf16.mxu1 %v1780_v35 }
 0x128   :  { %1278 = vmatpush1.bf16.msra.mxu1 %v1778_v37 }
 0x129   :  { %1279 = vmatprep.subr.bf16.mxu1 %v1786_v39 }
 0x12c   :  { %1280 = vmatpush1.bf16.msra.mxu1 %v1784_v41 }
 0x12d   :  { %1618 = vmatprep.subr.bf16.mxu1 %v1790_v43 }
 0x1c2   :  { %v283_v48 = vpop.f32.mrb[0].mxu1 }
 0x1c3   :  { %v285_v50 = vpop.f32.mrb[1].mxu1  ;;  %v2282_v57 = vadd.f32 %v283_v48, %v162_v52 }
 0x1c4   :  { %v287_v51 = vpop.f32.mrb[2].mxu1  ;;  %v2284_v58 = vadd.f32 %v285_v50, %v166_v54 }
 0x1c5   :  { %v289_v53 = vpop.f32.mrb[3].mxu1  ;;  %v2278_v55 = vadd.f32 %v287_v51, %v162_v52 }
 0x1c6   :  { %v2280_v56 = vadd.f32 %v289_v53, %v166_v54 }
 0x1c7   :  { %v302_v60 = vadd.f32 %v2278_v55, %v2282_v57 }
 0x1c8   :  { %v311_v63 = vadd.f32 %v2280_v56, %v2284_v58 }
 0x1ca   :  { %v293_v59 = vpop.f32.mrb[4].mxu1 }
 0x1cb   :  { %v2288_v61 = vadd.f32 %v293_v59, %v162_v52  ;;  %v295_v62 = vpop.f32.mrb[5].mxu1 }
 0x1cc   :  { %v2292_v0 = vadd.f32 %v295_v62, %v166_v54  ;;  %v297_v1 = vpop.f32.mrb[6].mxu1 }
 0x1cd   :  { %v303_v2 = vadd.f32 %v302_v60, %v2288_v61  ;;  %v2295_v3 = vadd.f32 %v297_v1, %v162_v52  ;;  %v299_v4 = vpop.f32.mrb[7].mxu1 }
 0x1ce   :  { %v312_v5 = vadd.f32 %v311_v63, %v2292_v0  ;;  %v2298_v6 = vadd.f32 %v299_v4, %v166_v54 }
 0x1cf   :  { %v304_v7 = vadd.f32 %v303_v2, %v2295_v3 }
 0x1d0   :  { %v313_v8 = vadd.f32 %v312_v5, %v2298_v6 }
 0x1d1   :  { %v305_v9 = vrot.slane %v304_v7, 4 }
 0x1d2   :  { %v314_v10 = vrot.slane %v313_v8, 4 }
 0x1d3   :  { %v306_v11 = vadd.f32 %v305_v9, %v304_v7 }
 0x1d4   :  { %v315_v12 = vadd.f32 %v314_v10, %v313_v8  ;;  %v1936_v8 = vmov 1966171168  }
 0x1d5   :  { %v307_v13 = vrot.slane %v306_v11, 2  ;;  %v368_v9 = vunpack.c.l.s4 %v1936_v8  ;;  %v1805_v8 = vld [vmem:[%s2523_s7 + $0x280] ss:$28 sps:$4 sm:$0xff]  }
 0x1d6   :  { %v316_v14 = vrot.slane %v315_v12, 2 }
 0x1d7   :  { %v308_v15 = vadd.f32 %v307_v13, %v306_v11  ;;  %v369_v10 = vunpack.c.0.s8 %v368_v9  ;;  %v1802_v9 = vld [vmem:[%s2523_s7 + $0xb8] ss:$28 sps:$4 sm:$0xff]  }
 0x1d8   :  { %v317_v16 = vadd.f32 %v316_v14, %v315_v12 }
 0x1d9   :  { %v309_v17 = vrot.slane %v308_v15, 1  ;;  %v372_v12 = vsub.s32 %v369_v10, %v2265_v45  ;;  %v1806_v10 = vld [vmem:[%s2523_s7 + $0xc0] ss:$28 sps:$4 sm:$0xff]  }
 0x1da   :  { %v318_v18 = vrot.slane %v317_v16, 1 }
 0x1db   :  { %v310_v19 = vadd.f32 %v309_v17, %v308_v15 }
 0x1dc   :  { %v319_v20 = vadd.f32 %v318_v18, %v317_v16  ;;  %v359_v16 = vld [vmem:[%s2521_s5] sm:$0x3] }
 0x1dd   :  { %v321_v21 = vmul.f32 0.03125, %v310_v19 }
 0x1de   :  { %v322_v22 = vmul.f32 0.03125, %v319_v20 }
 0x1df   :  { %v323_v23 = vsub.f32 %v2282_v57, %v321_v21  ;;  %v325_v24 = vsub.f32 %v2278_v55, %v321_v21  ;;  %v327_v25 = vsub.f32 %v2288_v61, %v321_v21  ;;  %v329_v29 = vsub.f32 %v2295_v3, %v321_v21 }
 0x1e0   :  { %v324_v26 = vsub.f32 %v2284_v58, %v322_v22  ;;  %v326_v27 = vsub.f32 %v2280_v56, %v322_v22  ;;  %v328_v28 = vsub.f32 %v2292_v0, %v322_v22  ;;  %v330_v32 = vsub.f32 %v2298_v6, %v322_v22 }
 0x1e1   :  { %v331_v30 = vmul.f32 %v323_v23, %v323_v23  ;;  %v333_v31 = vmul.f32 %v325_v24, %v325_v24  ;;  %v335_v35 = vmul.f32 %v327_v25, %v327_v25  ;;  %v337_v39 = vmul.f32 %v329_v29, %v329_v29 }
 0x1e2   :  { %v332_v33 = vmul.f32 %v324_v26, %v324_v26  ;;  %v334_v34 = vmul.f32 %v326_v27, %v326_v27  ;;  %v336_v37 = vmul.f32 %v328_v28, %v328_v28  ;;  %v338_v41 = vmul.f32 %v330_v32, %v330_v32  ;;  %v383_v28 = vld [vmem:[%s2522_s6] sm:$0x3] }
 0x1e3   :  { %v339_v36 = vadd.f32 %v333_v31, %v331_v30 }
 0x1e4   :  { %v348_v38 = vadd.f32 %v334_v34, %v332_v33 }
 0x1e5   :  { %v340_v40 = vadd.f32 %v339_v36, %v335_v35 }
 0x1e6   :  { %v349_v42 = vadd.f32 %v348_v38, %v336_v37 }
 0x1e7   :  { %v341_v43 = vadd.f32 %v340_v40, %v337_v39 }
 0x1e8   :  { %v350_v44 = vadd.f32 %v349_v42, %v338_v41 }
 0x1e9   :  { %v342_v47 = vrot.slane %v341_v43, 4 }
 0x1ea   :  { %v351_v48 = vrot.slane %v350_v44, 4 }
 0x1eb   :  { %v343_v50 = vadd.f32 %v342_v47, %v341_v43 }
 0x1ec   :  { %v352_v51 = vadd.f32 %v351_v48, %v350_v44 }
 0x1ed   :  { %v344_v52 = vrot.slane %v343_v50, 2 }
 0x1ee   :  { %v353_v53 = vrot.slane %v352_v51, 2 }
 0x1ef   :  { %v345_v54 = vadd.f32 %v344_v52, %v343_v50 }
 0x1f0   :  { %v354_v59 = vadd.f32 %v353_v53, %v352_v51 }
 0x1f1   :  { %v346_v60 = vrot.slane %v345_v54, 1 }
 0x1f2   :  { %v355_v62 = vrot.slane %v354_v59, 1 }
 0x1f3   :  { %v347_v63 = vadd.f32 %v346_v60, %v345_v54  ;;  %v1792_v54 = vld [vmem:[%s2523_s7 + $0x48] ss:$28 sps:$4 sm:$0xff]  }
 0x1f4   :  { %v356_v1 = vadd.f32 %v355_v62, %v354_v59  ;;  %v1796_v59 = vld [vmem:[%s2523_s7 + $0x50] ss:$28 sps:$4 sm:$0xff]   ;;  %v1799_v60 = vld [vmem:[%s2523_s7 + $0x84] ss:$28 sps:$4 sm:$0xff]  }
 0x1f5   :  { %v357_v2 = vmul.f32 0.03125, %v347_v63  ;;  %v1800_v62 = vld [vmem:[%s2523_s7 + $0x248] ss:$28 sps:$4 sm:$0xff]  }
 0x1f6   :  { %v358_v4 = vmul.f32 0.03125, %v356_v1 }
 0x1f7   :  { %v360_v5 = vadd.f32 1e-05, %v357_v2  ;;  %v1797_v2 = vld [vmem:[%s2523_s7 + $0x80] ss:$28 sps:$4 sm:$0xff]  }
 0x1f8   :  { %v361_v7 = vadd.f32 1e-05, %v358_v4  ;;  %v1801_v4 = vld [vmem:[%s2523_s7 + $0x88] ss:$28 sps:$4 sm:$0xff]  }
 0x1f9   :  { %1851 = vrsqrt.f32 %v360_v5 }
 0x1fa   :  { %1853 = vrsqrt.f32 %v361_v7  ;;  %v1804_v7 = vld [vmem:[%s2523_s7 + $0xbc] ss:$28 sps:$4 sm:$0xff]  }
 0x203   :  { %v1852_v11 = vpop.eup %1851 }
 0x204   :  { %v1854_v13 = vpop.eup %1853 }
 0x205   :  { %v366_v14 = vcombine.low %v1852_v11, %v1854_v13  ;;  %v1809_v11 = vld [vmem:[%s2523_s7 + $0xf4] ss:$28 sps:$4 sm:$0xff]  }
 0x206   :  { %v1807_v13 = vld [vmem:[%s2523_s7 + $0xf0] ss:$28 sps:$4 sm:$0xff]  }
 0x207   :  { %v373_v15 = vrot.slane %v366_v14, %v372_v12  ;;  %v1811_v14 = vld [vmem:[%s2523_s7 + $0xf8] ss:$28 sps:$4 sm:$0xff]  }
 0x209   :  { %v380_v17 = vrot.slane %v373_v15, %v372_v12  ;;  %v1814_v15 = vld [vmem:[%s2523_s7 + $0x12c] ss:$28 sps:$4 sm:$0xff]  }
 0x20b   :  { %v382_v18 = vmul.f32 %v380_v17, %v359_v16  ;;  %v1815_v16 = vld [vmem:[%s2523_s7 + $0x2f0] ss:$28 sps:$4 sm:$0xff]   ;;  %v1812_v17 = vld [vmem:[%s2523_s7 + $0x128] ss:$28 sps:$4 sm:$0xff]  }
 0x20d   :  { %v388_v19 = vrot.slane %v382_v18, %v2268_v46  ;;  %v392_v20 = vrot.slane %v382_v18, %v2274_v49  ;;  %v1816_v18 = vld [vmem:[%s2523_s7 + $0x130] ss:$28 sps:$4 sm:$0xff]  }
 0x20f   :  { %v395_v23 = vmul.f32 %v388_v19, %v321_v21  ;;  %v396_v24 = vmul.f32 %v392_v20, %v322_v22  ;;  %v423_v25 = vmul.f32 %v392_v20, %v2298_v6  ;;  %v417_v31 = vmul.f32 %v392_v20, %v2284_v58 }
 0x210   :  { %v419_v33 = vmul.f32 %v392_v20, %v2280_v56  ;;  %v416_v34 = vmul.f32 %v388_v19, %v2282_v57  ;;  %v418_v6 = vmul.f32 %v388_v19, %v2278_v55  ;;  %v421_v22 = vmul.f32 %v392_v20, %v2292_v0  ;;  %v1787_v55 = vld [vmem:[%s2523_s7 + $0x10] ss:$28 sps:$4 sm:$0xff]   ;;  %v1791_v0 = vld [vmem:[%s2523_s7 + $0x18] ss:$28 sps:$4 sm:$0xff]   ;;  %v1820_v20 = vld [vmem:[%s2523_s7 + $0x328] ss:$28 sps:$4 sm:$0xff]  }
 0x211   :  { %v399_v26 = vcombine.low %v395_v23, %v396_v24  ;;  %v420_v57 = vmul.f32 %v388_v19, %v2288_v61  ;;  %v422_v47 = vmul.f32 %v388_v19, %v2295_v3  ;;  %v1794_v61 = vld [vmem:[%s2523_s7 + $0x4c] ss:$28 sps:$4 sm:$0xff]   ;;  %v1819_v19 = vld [vmem:[%s2523_s7 + $0x164] ss:$28 sps:$4 sm:$0xff]  }
 0x212   :  { %v1795_v3 = vld [vmem:[%s2523_s7 + $0x210] ss:$28 sps:$4 sm:$0xff]   ;;  %v1817_v23 = vld [vmem:[%s2523_s7 + $0x160] ss:$28 sps:$4 sm:$0xff]   ;;  %v1821_v24 = vld [vmem:[%s2523_s7 + $0x168] ss:$28 sps:$4 sm:$0xff]  }
 0x213   :  { %v406_v27 = vrot.slane %v399_v26, %v372_v12  ;;  %v1825_v26 = vld [vmem:[%s2523_s7 + $0x360] ss:$28 sps:$4 sm:$0xff]  }
 0x215   :  { %v413_v29 = vrot.slane %v406_v27, %v372_v12  ;;  %v1810_v12 = vld [vmem:[%s2523_s7 + $0x2b8] ss:$28 sps:$4 sm:$0xff]  }
 0x216   :  { %v1822_v27 = vld [vmem:[%s2523_s7 + $0x198] ss:$28 sps:$4 sm:$0xff]  }
 0x217   :  { %v415_v30 = vsub.f32 %v383_v28, %v413_v29  ;;  %v1826_v28 = vld [vmem:[%s2523_s7 + $0x1a0] ss:$28 sps:$4 sm:$0xff]   ;;  %v1829_v29 = vld [vmem:[%s2523_s7 + $0x1d4] ss:$28 sps:$4 sm:$0xff]  }
 0x219   :  { %v432_v32 = vrot.slane %v415_v30, %v2274_v49  ;;  %v428_v21 = vrot.slane %v415_v30, %v2268_v46  ;;  %v1827_v30 = vld [vmem:[%s2523_s7 + $0x1d0] ss:$28 sps:$4 sm:$0xff]  }
 0x21b   :  { %v442_v35 = vadd.f32 %v432_v32, %v423_v25  ;;  %v436_v36 = vadd.f32 %v432_v32, %v417_v31  ;;  %v438_v37 = vadd.f32 %v432_v32, %v419_v33  ;;  %v435_v38 = vadd.f32 %v428_v21, %v416_v34  ;;  %v1824_v25 = vld [vmem:[%s2523_s7 + $0x19c] ss:$28 sps:$4 sm:$0xff]   ;;  %v1832_v31 = vld [vmem:[%s2523_s7 + $0x20c] ss:$28 sps:$4 sm:$0xff]   ;;  %v1835_v33 = vld [vmem:[%s2523_s7 + $0x244] ss:$28 sps:$4 sm:$0xff]  }
 0x21c   :  { %v437_v39 = vadd.f32 %v428_v21, %v418_v6  ;;  %v440_v40 = vadd.f32 %v432_v32, %v421_v22  ;;  %v439_v52 = vadd.f32 %v428_v21, %v420_v57  ;;  %v441_v53 = vadd.f32 %v428_v21, %v422_v47  ;;  %v1830_v32 = vld [vmem:[%s2523_s7 + $0x208] ss:$28 sps:$4 sm:$0xff]   ;;  %v1833_v34 = vld [vmem:[%s2523_s7 + $0x240] ss:$28 sps:$4 sm:$0xff]   ;;  %v1836_v6 = vld [vmem:[%s2523_s7 + $0x278] ss:$28 sps:$4 sm:$0xff]  }
 0x21d   :  { %v450_v41 = vmax.f32 %v442_v35, 0.0  ;;  %v444_v58 = vmax.f32 %v436_v36, 0.0  ;;  %v446_v42 = vmax.f32 %v438_v37, 0.0  ;;  %v443_v43 = vmax.f32 %v435_v38, 0.0  ;;  %v1838_v21 = vld [vmem:[%s2523_s7 + $0x27c] ss:$28 sps:$4 sm:$0xff]  }
 0x21e   :  { %v445_v44 = vmax.f32 %v437_v39, 0.0  ;;  %v448_v56 = vmax.f32 %v440_v40, 0.0  ;;  %v447_v63 = vmax.f32 %v439_v52, 0.0  ;;  %v449_v1 = vmax.f32 %v441_v53, 0.0  ;;  %v1841_v22 = vld [vmem:[%s2523_s7 + $0x2b4] ss:$28 sps:$4 sm:$0xff]  }
 0x21f   :  { %v452_v48 = vpack.c.bf16 %v446_v42, %v444_v58  ;;  %v1839_v35 = vld [vmem:[%s2523_s7 + $0x2b0] ss:$28 sps:$4 sm:$0xff]   ;;  %v1842_v37 = vld [vmem:[%s2523_s7 + $0x2e8] ss:$28 sps:$4 sm:$0xff]   ;;  %v1845_v39 = vld [vmem:[%s2523_s7 + $0x320] ss:$28 sps:$4 sm:$0xff]  }
 0x220   :  { %v2335_v50 = vpack.c.bf16 %v445_v44, %v443_v43  ;;  %v2337_v51 = vpack.c.bf16 %v450_v41, %v448_v56  ;;  %v2367_v5 = vpack.c.bf16 %v449_v1, %v447_v63  ;;  %v1844_v36 = vld [vmem:[%s2523_s7 + $0x2ec] ss:$28 sps:$4 sm:$0xff]   ;;  %v1847_v38 = vld [vmem:[%s2523_s7 + $0x324] ss:$28 sps:$4 sm:$0xff]   ;;  %v1850_v40 = vld [vmem:[%s2523_s7 + $0x35c] ss:$28 sps:$4 sm:$0xff]  }
 0x221   :  { %1228 = vmatprep.mubr.bf16.mxu0 %v452_v48  ;;  %1281 = vmatprep.mubr.bf16.mxu1 %v452_v48  ;;  %v1848_v41 = vld [vmem:[%s2523_s7 + $0x358] ss:$28 sps:$4 sm:$0xff]   ;;  %v595_v58 = vsub.s32 2, %v2265_v45  ;;  %v2489_v42 = vld [vmem:[%s2524_s8] sm:$0x7f]  ;;  %v599_v43 = vsub.s32 3, %v2265_v45 }
 0x222   :  { %1229 = vmatmul.mubr.bf16.vlgmr.msra.gmra.mrb[4].mxu0 %v2335_v50  ;;  %1282 = vmatmul.mubr.bf16.vlgmr.msra.gmra.mrb[8].mxu1 %v2335_v50  ;;  %v588_v44 = vrot.slane %v2489_v42, %v2268_v46  ;;  %v592_v57 = vrot.slane %v2489_v42, %v2274_v49  ;;  %s1937_s7 = smov [#allocation2]  }
 0x223   :  { %1303 = vmatpush1.bf16.msra.mxu0 %v1787_v55  ;;  %1619 = vmatpush3.bf16.msra.mxu1 %v1791_v0  ;;  %v596_v56 = vrot.slane %v2489_v42, %v595_v58  ;;  %v600_v47 = vrot.slane %v2489_v42, %v599_v43  ;;  %s1466_s8 = sshll.u32 %s1937_s7, 4  ;;  %s1467_s8 = int_to_ptr.vmem [resolvable:$true] %s1466_s8 }
 0x224   :  { %1238 = vmatprep.mubr.bf16.mxu0 %v2337_v51  ;;  %1291 = vmatprep.mubr.bf16.mxu1 %v2337_v51  ;;  %s1911_s10 = scalar_lea.vmem %s1467_s8, 3584  ;;  %p1916_p1 = scmp.lt.s32.totalorder %s1467_s8, %s1467_s8 }
 0x225   :  { %1304 = vmatprep.subr.bf16.mxu0 %v1794_v61  ;;  %1620 = vmatprep.subr.bf16.mxu1 %v1795_v3  ;;  %p1912_p0 = scmp.ne.s32.totalorder %s1467_s8, %s1911_s10  ;;  %p1917_p2 = scmp.lt.s32.totalorder %s1911_s10, %s1911_s10 }
 0x227   :  { %1305 = vmatpush1.bf16.msra.mxu0 %v1792_v54  ;;  %1621 = vmatpush3.bf16.msra.mxu1 %v1796_v59  ;;  %p1918_p3 = por %p1917_p2, %p1916_p1 }
 0x228   :  { %1306 = vmatprep.subr.bf16.mxu0 %v1799_v60  ;;  %1622 = vmatprep.subr.bf16.mxu1 %v1800_v62 }
 0x229   :  { %p1919_p4 = pnand %p1918_p3, %p1912_p0 }
 0x22a   :  { %1239 = vmatmul.mubr.bf16.gmra.mrb[8].mxu0 %v2367_v5  ;;  %1292 = vmatmul.mubr.bf16.gmra.mrb[12].mxu1 %v2367_v5 }
 0x22b   :  { %1307 = vmatpush1.bf16.msra.mxu0 %v1797_v2  ;;  %1623 = vmatpush3.bf16.msra.mxu1 %v1801_v4 }
 0x22c   :  { %1334 = vmatprep.mubr.bf16.mxu0 %v452_v48  ;;  %1387 = vmatprep.mubr.bf16.mxu1 %v452_v48 }
 0x22d   :  { %1308 = vmatprep.subr.bf16.mxu0 %v1804_v7  ;;  %1624 = vmatprep.subr.bf16.mxu1 %v1805_v8 }
 0x22f   :  { %1309 = vmatpush1.bf16.msra.mxu0 %v1802_v9  ;;  %1625 = vmatpush3.bf16.msra.mxu1 %v1806_v10 }
 0x230   :  { %1310 = vmatprep.subr.bf16.mxu0 %v1809_v11  ;;  %1626 = vmatprep.subr.bf16.mxu1 %v1810_v12 }
 0x233   :  { %1311 = vmatpush1.bf16.msra.mxu0 %v1807_v13  ;;  %1627 = vmatpush3.bf16.msra.mxu1 %v1811_v14 }
 0x234   :  { %1312 = vmatprep.subr.bf16.mxu0 %v1814_v15  ;;  %1628 = vmatprep.subr.bf16.mxu1 %v1815_v16 }
 0x237   :  { %1313 = vmatpush1.bf16.msra.mxu0 %v1812_v17  ;;  %1629 = vmatpush3.bf16.msra.mxu1 %v1816_v18 }
 0x238   :  { %1314 = vmatprep.subr.bf16.mxu0 %v1819_v19  ;;  %1630 = vmatprep.subr.bf16.mxu1 %v1820_v20 }
 0x23b   :  { %1315 = vmatpush1.bf16.msra.mxu0 %v1817_v23  ;;  %1631 = vmatpush3.bf16.msra.mxu1 %v1821_v24 }
 0x23c   :  { %1316 = vmatprep.subr.bf16.mxu0 %v1824_v25  ;;  %1632 = vmatprep.subr.bf16.mxu1 %v1825_v26 }
 0x23f   :  { %1317 = vmatpush1.bf16.msra.mxu0 %v1822_v27  ;;  %1633 = vmatpush3.bf16.msra.mxu1 %v1826_v28 }
 0x240   :  { %1318 = vmatprep.subr.bf16.mxu0 %v1829_v29 }
 0x242   :  { %1388 = vmatmul.mubr.bf16.vlgmr.msra.gmra.mrb[16].mxu1 %v2335_v50 }
 0x243   :  { %1319 = vmatpush1.bf16.msra.mxu0 %v1827_v30  ;;  %1395 = vmatprep.mubr.bf16.mxu1 %v2337_v51 }
 0x244   :  { %1320 = vmatprep.subr.bf16.mxu0 %v1832_v31 }
 0x247   :  { %1321 = vmatpush1.bf16.msra.mxu0 %v1830_v32 }
 0x248   :  { %1322 = vmatprep.subr.bf16.mxu0 %v1835_v33 }
 0x24a   :  { %1396 = vmatmul.mubr.bf16.gmra.mrb[20].mxu1 %v2367_v5 }
 0x24b   :  { %1323 = vmatpush1.bf16.msra.mxu0 %v1833_v34 }
 0x24c   :  { %1324 = vmatprep.subr.bf16.mxu0 %v1838_v21 }
 0x24f   :  { %1325 = vmatpush1.bf16.msra.mxu0 %v1836_v6 }
 0x250   :  { %1326 = vmatprep.subr.bf16.mxu0 %v1841_v22  ;;  %v611_v22 = vsub.s32 6, %v2265_v45 }
 0x253   :  { %1327 = vmatpush1.bf16.msra.mxu0 %v1839_v35 }
 0x254   :  { %1328 = vmatprep.subr.bf16.mxu0 %v1844_v36  ;;  %v612_v36 = vrot.slane %v2489_v42, %v611_v22 }
 0x257   :  { %1329 = vmatpush1.bf16.msra.mxu0 %v1842_v37 }
 0x258   :  { %1330 = vmatprep.subr.bf16.mxu0 %v1847_v38 }
 0x25b   :  { %1331 = vmatpush1.bf16.msra.mxu0 %v1845_v39 }
 0x25c   :  { %1332 = vmatprep.subr.bf16.mxu0 %v1850_v40 }
 0x25f   :  { %1333 = vmatpush1.bf16.msra.mxu0 %v1848_v41 }
 0x262   :  { %1335 = vmatmul.mubr.bf16.vlgmr.msra.gmra.mrb[12].mxu0 %v2335_v50 }
 0x263   :  { %1344 = vmatprep.mubr.bf16.mxu0 %v2337_v51 }
 0x26a   :  { %1345 = vmatmul.mubr.bf16.gmra.mrb[16].mxu0 %v2367_v5 }
 0x2f5   :  { %v1230_v48 = vpop.f32.mrb[4].mxu0  ;;  %v1283_v55 = vpop.f32.mrb[8].mxu1 }
 0x2f6   :  { %v1231_v0 = vadd.f32 %v1230_v48, %v588_v44  ;;  %v1284_v50 = vadd.f32 %v1283_v55, %v596_v56  ;;  %v1232_v51 = vpop.f32.mrb[5].mxu0  ;;  %v1285_v52 = vpop.f32.mrb[9].mxu1 }
 0x2f7   :  { %v1233_v53 = vadd.f32 %v1232_v51, %v592_v57  ;;  %v1286_v61 = vadd.f32 %v1285_v52, %v600_v47  ;;  %v1234_v3 = vpop.f32.mrb[6].mxu0  ;;  %v1287_v54 = vpop.f32.mrb[10].mxu1 }
 0x2f8   :  { %1855 = vtanh.f32 %v1231_v0  ;;  %v1235_v59 = vadd.f32 %v1234_v3, %v588_v44  ;;  %v1236_v46 = vpop.f32.mrb[7].mxu0  ;;  %v1289_v60 = vpop.f32.mrb[11].mxu1  ;;  %v1288_v62 = vadd.f32 %v1287_v54, %v596_v56  ;;  %v607_v54 = vsub.s32 5, %v2265_v45 }
 0x2f9   :  { %1857 = vtanh.f32 %v1284_v50  ;;  %v1237_v49 = vadd.f32 %v1236_v46, %v592_v57  ;;  %v1290_v63 = vadd.f32 %v1289_v60, %v600_v47 }
 0x2fa   :  { %1859 = vtanh.f32 %v1233_v53  ;;  %v608_v46 = vrot.slane %v2489_v42, %v607_v54 }
 0x2fb   :  { %1861 = vtanh.f32 %v1286_v61  ;;  %v603_v61 = vsub.s32 4, %v2265_v45 }
 0x2fc   :  { %1863 = vtanh.f32 %v1235_v59 }
 0x2fd   :  { %1865 = vtanh.f32 %v1288_v62  ;;  %v1240_v1 = vpop.f32.mrb[8].mxu0  ;;  %v1293_v2 = vpop.f32.mrb[12].mxu1  ;;  %v604_v59 = vrot.slane %v2489_v42, %v603_v61 }
 0x2fe   :  { %1867 = vtanh.f32 %v1237_v49  ;;  %v1241_v4 = vadd.f32 %v1240_v1, %v588_v44  ;;  %v1294_v5 = vadd.f32 %v1293_v2, %v596_v56  ;;  %v1242_v7 = vpop.f32.mrb[9].mxu0  ;;  %v1295_v8 = vpop.f32.mrb[13].mxu1 }
 0x2ff   :  { %1869 = vtanh.f32 %v1290_v63  ;;  %v1243_v9 = vadd.f32 %v1242_v7, %v592_v57  ;;  %v1296_v10 = vadd.f32 %v1295_v8, %v600_v47  ;;  %v1244_v11 = vpop.f32.mrb[10].mxu0  ;;  %v1297_v12 = vpop.f32.mrb[14].mxu1 }
 0x300   :  { %1871 = vtanh.f32 %v1241_v4  ;;  %v1245_v13 = vadd.f32 %v1244_v11, %v588_v44  ;;  %v1246_v14 = vpop.f32.mrb[11].mxu0  ;;  %v1299_v15 = vpop.f32.mrb[15].mxu1  ;;  %v1298_v16 = vadd.f32 %v1297_v12, %v596_v56 }
 0x301   :  { %1873 = vtanh.f32 %v1294_v5  ;;  %v1247_v18 = vadd.f32 %v1246_v14, %v592_v57  ;;  %v1300_v20 = vadd.f32 %v1299_v15, %v600_v47 }
 0x302   :  { %v1856_v17 = vpop.eup %1855  ;;  %1875 = vtanh.f32 %v1243_v9 }
 0x303   :  { %v1858_v19 = vpop.eup %1857  ;;  %1432 = vst [vmem:[#allocation2] sm:$0xff] %v1856_v17  ;;  %1877 = vtanh.f32 %v1296_v10 }
 0x304   :  { %v1860_v23 = vpop.eup %1859  ;;  %1434 = vst [vmem:[#allocation2 + $0x10] sm:$0xff] %v1858_v19  ;;  %1879 = vtanh.f32 %v1245_v13 }
 0x305   :  { %v1862_v24 = vpop.eup %1861  ;;  %1433 = vst [vmem:[#allocation2 + $0x8] sm:$0xff] %v1860_v23  ;;  %1881 = vtanh.f32 %v1298_v16 }
 0x306   :  { %v1864_v25 = vpop.eup %1863  ;;  %1435 = vst [vmem:[#allocation2 + $0x18] sm:$0xff] %v1862_v24  ;;  %1883 = vtanh.f32 %v1247_v18 }
 0x307   :  { %v1866_v26 = vpop.eup %1865  ;;  %1440 = vst [vmem:[#allocation2 + $0x38] sm:$0xff] %v1864_v25  ;;  %1885 = vtanh.f32 %v1300_v20 }
 0x308   :  { %v1868_v27 = vpop.eup %1867  ;;  %1442 = vst [vmem:[#allocation2 + $0x48] sm:$0xff] %v1866_v26 }
 0x309   :  { %v1870_v28 = vpop.eup %1869  ;;  %1441 = vst [vmem:[#allocation2 + $0x40] sm:$0xff] %v1868_v27 }
 0x30a   :  { %v1872_v29 = vpop.eup %1871  ;;  %1443 = vst [vmem:[#allocation2 + $0x50] sm:$0xff] %v1870_v28 }
 0x30b   :  { %v1874_v30 = vpop.eup %1873  ;;  %1447 = vst [vmem:[#allocation2 + $0x70] sm:$0xff] %v1872_v29 }
 0x30c   :  { %v1876_v31 = vpop.eup %1875  ;;  %1449 = vst [vmem:[#allocation2 + $0x80] sm:$0xff] %v1874_v30 }
 0x30d   :  { %v1878_v32 = vpop.eup %1877  ;;  %1448 = vst [vmem:[#allocation2 + $0x78] sm:$0xff] %v1876_v31 }
 0x30e   :  { %v1880_v33 = vpop.eup %1879  ;;  %1450 = vst [vmem:[#allocation2 + $0x88] sm:$0xff] %v1878_v32 }
 0x30f   :  { %v1882_v34 = vpop.eup %1881  ;;  %1454 = vst [vmem:[#allocation2 + $0xa8] sm:$0xff] %v1880_v33 }
 0x310   :  { %v1884_v21 = vpop.eup %1883  ;;  %1456 = vst [vmem:[#allocation2 + $0xb8] sm:$0xff] %v1882_v34 }
 0x311   :  { %v1886_v6 = vpop.eup %1885  ;;  %1455 = vst [vmem:[#allocation2 + $0xb0] sm:$0xff] %v1884_v21 }
 0x312   :  { %1457 = vst [vmem:[#allocation2 + $0xc0] sm:$0xff] %v1886_v6 }
 0x315   :  { %v1634_v35 = vpop.f32.mrb[16].mxu1 }
 0x316   :  { %v1635_v37 = vpop.f32.mrb[17].mxu1 }
 0x317   :  { %v1636_v38 = vadd.f32 %v1635_v37, %v1634_v35  ;;  %v1637_v39 = vpop.f32.mrb[18].mxu1 }
 0x318   :  { %v1638_v40 = vpop.f32.mrb[19].mxu1 }
 0x319   :  { %v1390_v41 = vadd.f32 %v1636_v38, %v612_v36  ;;  %v1639_v58 = vadd.f32 %v1638_v40, %v1637_v39 }
 0x31b   :  { %1887 = vtanh.f32 %v1390_v41  ;;  %v1393_v43 = vadd.f32 %v1639_v58, %v612_v36 }
 0x31d   :  { %1889 = vtanh.f32 %v1393_v43  ;;  %v1640_v44 = vpop.f32.mrb[20].mxu1 }
 0x31e   :  { %v1641_v56 = vpop.f32.mrb[21].mxu1 }
 0x31f   :  { %v1642_v57 = vadd.f32 %v1641_v56, %v1640_v44  ;;  %v1643_v47 = vpop.f32.mrb[22].mxu1 }
 0x320   :  { %v1644_v48 = vpop.f32.mrb[23].mxu1 }
 0x321   :  { %v1398_v55 = vadd.f32 %v1642_v57, %v612_v36  ;;  %v1645_v0 = vadd.f32 %v1644_v48, %v1643_v47 }
 0x323   :  { %1891 = vtanh.f32 %v1398_v55  ;;  %v1401_v50 = vadd.f32 %v1645_v0, %v612_v36 }
 0x325   :  { %v1888_v51 = vpop.eup %1887  ;;  %1893 = vtanh.f32 %v1401_v50 }
 0x326   :  { %1439 = vst.msk [vmem:[#allocation2 + $0x30] sm:$0xff] %vm1438_vm1, %v1888_v51 }
 0x327   :  { %v1890_v52 = vpop.eup %1889 }
 0x328   :  { %1446 = vst.msk [vmem:[#allocation2 + $0x68] sm:$0xff] %vm1438_vm1, %v1890_v52 }
 0x32d   :  { %v1892_v53 = vpop.eup %1891 }
 0x32e   :  { %1453 = vst.msk [vmem:[#allocation2 + $0xa0] sm:$0xff] %vm1438_vm1, %v1892_v53 }
 0x32f   :  { %v1894_v3 = vpop.eup %1893 }
 0x330   :  { %1460 = vst.msk [vmem:[#allocation2 + $0xd8] sm:$0xff] %vm1438_vm1, %v1894_v3 }
 0x335   :  { %v1336_v60 = vpop.f32.mrb[12].mxu0 }
 0x336   :  { %v1337_v62 = vadd.f32 %v1336_v60, %v604_v59  ;;  %v1338_v49 = vpop.f32.mrb[13].mxu0 }
 0x337   :  { %v1339_v63 = vadd.f32 %v1338_v49, %v608_v46  ;;  %v1340_v1 = vpop.f32.mrb[14].mxu0 }
 0x338   :  { %1895 = vtanh.f32 %v1337_v62  ;;  %v1341_v2 = vadd.f32 %v1340_v1, %v604_v59  ;;  %v1342_v4 = vpop.f32.mrb[15].mxu0 }
 0x339   :  { %1897 = vtanh.f32 %v1339_v63  ;;  %v1343_v5 = vadd.f32 %v1342_v4, %v608_v46 }
 0x33a   :  { %1899 = vtanh.f32 %v1341_v2 }
 0x33b   :  { %1901 = vtanh.f32 %v1343_v5 }
 0x33d   :  { %v1346_v7 = vpop.f32.mrb[16].mxu0 }
 0x33e   :  { %v1347_v8 = vadd.f32 %v1346_v7, %v604_v59  ;;  %v1348_v45 = vpop.f32.mrb[17].mxu0 }
 0x33f   :  { %v1349_v9 = vadd.f32 %v1348_v45, %v608_v46  ;;  %v1350_v10 = vpop.f32.mrb[18].mxu0 }
 0x340   :  { %1903 = vtanh.f32 %v1347_v8  ;;  %v1351_v11 = vadd.f32 %v1350_v10, %v604_v59  ;;  %v1352_v42 = vpop.f32.mrb[19].mxu0 }
 0x341   :  { %1905 = vtanh.f32 %v1349_v9  ;;  %v1353_v12 = vadd.f32 %v1352_v42, %v608_v46 }
 0x342   :  { %v1896_v13 = vpop.eup %1895  ;;  %1907 = vtanh.f32 %v1351_v11 }
 0x343   :  { %v1898_v14 = vpop.eup %1897  ;;  %1436 = vst [vmem:[#allocation2 + $0x20] sm:$0xff] %v1896_v13  ;;  %1909 = vtanh.f32 %v1353_v12 }
 0x344   :  { %v1900_v15 = vpop.eup %1899  ;;  %1437 = vst [vmem:[#allocation2 + $0x28] sm:$0xff] %v1898_v14 }
 0x345   :  { %v1902_v16 = vpop.eup %1901  ;;  %1444 = vst [vmem:[#allocation2 + $0x58] sm:$0xff] %v1900_v15 }
 0x346   :  { %1445 = vst [vmem:[#allocation2 + $0x60] sm:$0xff] %v1902_v16 }
 0x34a   :  { %v1904_v17 = vpop.eup %1903 }
 0x34b   :  { %v1906_v18 = vpop.eup %1905  ;;  %1451 = vst [vmem:[#allocation2 + $0x90] sm:$0xff] %v1904_v17 }
 0x34c   :  { %v1908_v19 = vpop.eup %1907  ;;  %1452 = vst [vmem:[#allocation2 + $0x98] sm:$0xff] %v1906_v18 }
 0x34d   :  { %v1910_v20 = vpop.eup %1909  ;;  %1458 = vst [vmem:[#allocation2 + $0xc8] sm:$0xff] %v1908_v19 }
 0x34e   :  { %1459 = vst [vmem:[#allocation2 + $0xd0] sm:$0xff] %v1910_v20 }
 0x34f   :  { %1922 = shalt.err (!%p1919_p4)
}
 0x350   :  { %s1923_s13 = scalar_lea.hbm %s2525_s9, 3584 }
 0x351   :  { %p1924_p5 = scmp.ne.s32.totalorder %s2525_s9, %s1923_s13  ;;  %p1927_p6 = scmp.lt.u32.totalorder %s1923_s13, %s2525_s9 }
 0x353   :  { %p1929_p7 = pnand %p1927_p6, %p1924_p5 }
 0x355   :  { %1932 = shalt.err (!%p1929_p7)
}
 0x356   :  { %s1938_s15 = smov 896   ;;  %s1939_s16 = smov 56  }
 0x357   :  { %1472 = dma.vmem_to_hbm [thread:$0]  %s1467_s8, 3584, %s2525_s9, [#allocation3], %s1938_s15, %s1938_s15, %s1939_s16  }
 0x358   :  { %1933 = dma.done.wait [#allocation3], 3584  }
 0x359   :  { %1934 = vsyncadd [#allocation3], 4294963712 }
 0x35a   :  { %1476 = vsyncpa [#allocation3], 1 }

</bundles_post_ra>
